<compile_context>
chip_gen: v6e
topology: v6e:2x2x1
jax: 0.10.0
libtpu: 0.0.40
codegen_flags: <defaults>
</compile_context>

<pallas_src>
import functools

import jax
import jax.numpy as jnp
from jax import lax
from jax.experimental import pallas as pl
from jax.experimental.pallas import tpu as pltpu

LN_EPS = 1e-5
# v7x-safe lane budget per weight tile: Nt=2048 bf16 * Din~1280 ~= 5 MiB,
# ~10 MiB double-buffered -- comfortably under the 32 MiB scoped default.
_MAX_BLOCK_N = 2048


def _proj_norm_kernel(x_ref, w_ref, b_ref, g_ref, beta_ref, o_ref, *,
                      tokens_per_block, cross_attention_dim):
    # x_ref:    (B, Din)       image embeddings (compute dtype) -- resident
    # w_ref:    (Din, Nt)      weight tile, pre-transposed (compute dtype)
    # b_ref:    (1, Nt)        Linear bias tile (f32)
    # g_ref:    (1, C)         LayerNorm gamma (f32) -- resident
    # beta_ref: (1, C)         LayerNorm beta  (f32) -- resident
    # o_ref:    (B, Nt)        lane-dense output tile
    C = cross_attention_dim

    x = x_ref[...]
    w = w_ref[...]

    # Plain MXU matmul: contraction (Din) is the sublane axis of W -- no
    # in-kernel weight relayout.  f32 accumulation.
    y = jnp.dot(x, w, preferred_element_type=jnp.float32)        # (B, Nt) f32
    y = y + b_ref[...].astype(jnp.float32)

    gamma = g_ref[...].astype(jnp.float32)                       # (1, C)
    beta = beta_ref[...].astype(jnp.float32)                     # (1, C)

    # Per-token LayerNorm over the last (cross_attention) dim, f32 throughout.
    # tokens_per_block is small and static -> unrolled loop over 128-aligned
    # static lane slices; results are concatenated (free, lane-aligned) and
    # written with a single full-width store.
    parts = []
    for t in range(tokens_per_block):
        y_t = y[:, t * C:(t + 1) * C]                            # (B, C)
        mean = jnp.mean(y_t, axis=-1, keepdims=True)
        cent = y_t - mean
        var = jnp.mean(cent * cent, axis=-1, keepdims=True)
        y_norm = cent * lax.rsqrt(var + LN_EPS)
        parts.append(y_norm * gamma + beta)                      # implicit (1,C) bcast
    out = parts[0] if tokens_per_block == 1 else jnp.concatenate(parts, axis=-1)
    o_ref[...] = out.astype(o_ref.dtype)                         # one unmasked store


def _choose_tokens_per_block(num_tokens, cross_attention_dim,
                             max_block_n=_MAX_BLOCK_N):
    """Largest divisor of T whose tile (tokens*C lanes) fits the v7x-safe budget."""
    best = 1
    for d in range(1, num_tokens + 1):
        if num_tokens % d == 0 and d * cross_attention_dim <= max_block_n:
            best = d
    return best


def prepare_image_proj_params(proj_w, proj_b, ln_gamma, ln_beta, *,
                              compute_dtype=jnp.bfloat16):
    """One-time parameter prep (do this at model-setup time, not per call):
    cast the weight to the compute dtype and transpose to (Din, T*C)."""
    proj_w = jnp.asarray(proj_w)
    return {
        "w_t": proj_w.astype(compute_dtype).T,                   # (Din, T*C)
        "b": jnp.asarray(proj_b).astype(jnp.float32).reshape(1, -1),
        "gamma": jnp.asarray(ln_gamma).astype(jnp.float32).reshape(1, -1),
        "beta": jnp.asarray(ln_beta).astype(jnp.float32).reshape(1, -1),
    }


def image_proj_model(image_embeds, params, *, num_tokens, cross_attention_dim):
    """image_embeds: [B, Din]; params from prepare_image_proj_params.
    Returns [B, T, C] in image_embeds.dtype."""
    B, Din = image_embeds.shape
    T, C = num_tokens, cross_attention_dim
    N = T * C
    assert C % 128 == 0, "cross_attention_dim must be a multiple of 128 (lane width)"
    assert params["w_t"].shape == (Din, N)
    assert params["gamma"].shape == (1, C) and params["beta"].shape == (1, C)

    tokens_per_block = _choose_tokens_per_block(T, C)
    block_n = tokens_per_block * C
    grid = (N // block_n,)

    # Activations are cast per call (tiny); the weight is already prepared.
    compute_dtype = params["w_t"].dtype
    x_in = image_embeds.astype(compute_dtype)

    kernel = functools.partial(_proj_norm_kernel,
                               tokens_per_block=tokens_per_block,
                               cross_attention_dim=C)

    itemsize = jnp.dtype(compute_dtype).itemsize
    out_itemsize = jnp.dtype(image_embeds.dtype).itemsize
    cost = pl.CostEstimate(
        flops=2 * B * Din * N,
        transcendentals=0,
        bytes_accessed=(Din * N * itemsize          # weight (dominant)
                        + B * Din * itemsize        # x
                        + N * 4 + 2 * C * 4         # bias + gamma/beta
                        + B * N * out_itemsize),    # output
    )

    out_flat = pl.pallas_call(
        kernel,
        out_shape=jax.ShapeDtypeStruct((B, N), image_embeds.dtype),
        grid=grid,
        in_specs=[
            pl.BlockSpec((B, Din), lambda j: (0, 0)),      # x: resident across grid
            pl.BlockSpec((Din, block_n), lambda j: (0, j)),  # weight tile
            pl.BlockSpec((1, block_n), lambda j: (0, j)),    # bias tile
            pl.BlockSpec((1, C), lambda j: (0, 0)),          # gamma: resident
            pl.BlockSpec((1, C), lambda j: (0, 0)),          # beta: resident
        ],
        out_specs=pl.BlockSpec((B, block_n), lambda j: (0, j)),
        compiler_params=pltpu.CompilerParams(
            dimension_semantics=("parallel",)),              # shard N tiles across TCs (v7x)
        cost_estimate=cost,
    )(x_in, params["w_t"], params["b"], params["gamma"], params["beta"])

    # Pure metadata reshape (row-major): (B, T*C) -> (B, T, C). No transpose.
    return out_flat.reshape(B, T, C)


def _reference(image_embeds, proj_w, proj_b, ln_gamma, ln_beta,
               num_tokens, cross_attention_dim):
    B = image_embeds.shape[0]
    y = image_embeds @ proj_w.T + proj_b
    y = y.reshape(B, num_tokens, cross_attention_dim)
    mean = jnp.mean(y, axis=-1, keepdims=True)
    var = jnp.mean((y - mean) ** 2, axis=-1, keepdims=True)
    y = (y - mean) / jnp.sqrt(var + LN_EPS)
    return y * ln_gamma + ln_beta


if __name__ == "__main__":
    # Small shapes consistent with the module's forward:
    #   clip_embeddings_dim (Din) = 256, cross_attention_dim (C) = 128,
    #   clip_extra_context_tokens (T) = 4, batch B = 2.
    B, Din, C, T = 2, 256, 128, 4

    key = jax.random.PRNGKey(0)
    k_x, k_w, k_b, k_g, k_be = jax.random.split(key, 5)

    image_embeds = jax.random.normal(k_x, (B, Din), dtype=jnp.float32)
    proj_w = jax.random.normal(k_w, (T * C, Din), dtype=jnp.float32) * 0.02
    proj_b = jax.random.normal(k_b, (T * C,), dtype=jnp.float32) * 0.02
    ln_gamma = 1.0 + 0.1 * jax.random.normal(k_g, (C,), dtype=jnp.float32)
    ln_beta = 0.1 * jax.random.normal(k_be, (C,), dtype=jnp.float32)

    ref = _reference(image_embeds, proj_w, proj_b, ln_gamma, ln_beta, T, C)

    # f32 matmul path: tight check against the PyTorch-style reference.
    params_f32 = prepare_image_proj_params(proj_w, proj_b, ln_gamma, ln_beta,
                                           compute_dtype=jnp.float32)
    out_f32 = image_proj_model(image_embeds, params_f32,
                               num_tokens=T, cross_attention_dim=C)
    out_f32 = jax.block_until_ready(out_f32)
    assert out_f32.shape == (B, T, C)
    assert jnp.allclose(out_f32, ref, atol=1e-3, rtol=1e-3)

    # bf16 matmul path (default, perf-recommended): weight prepared once in
    # bf16 + (Din, T*C) layout; f32 accumulation + f32 LayerNorm, so error
    # stays at the bf16-operand level.  Output dtype follows image_embeds
    # (f32 here); with bf16 inputs the LN result is rounded to bf16.
    params_bf16 = prepare_image_proj_params(proj_w, proj_b, ln_gamma, ln_beta)
    out_bf16 = image_proj_model(image_embeds, params_bf16,
                                num_tokens=T, cross_attention_dim=C)
    out_bf16 = jax.block_until_ready(out_bf16)
    assert out_bf16.shape == (B, T, C)
    assert jnp.allclose(out_bf16, ref, atol=3e-2, rtol=3e-2)

    print("KERNEL_OK")
</pallas_src>

<mosaic_0001>
module attributes {stable_mosaic.version = 11 : i64} {
  func.func @_proj_norm_kernel(%arg0: i32, %arg1: memref<2x256xf32, #tpu.memory_space<vmem>>, %arg2: memref<256x512xf32, #tpu.memory_space<vmem>>, %arg3: memref<1x512xf32, #tpu.memory_space<vmem>>, %arg4: memref<1x128xf32, #tpu.memory_space<vmem>>, %arg5: memref<1x128xf32, #tpu.memory_space<vmem>>, %arg6: memref<2x512xf32, #tpu.memory_space<vmem>>) attributes {dimension_semantics = [#tpu.dimension_semantics<parallel>], iteration_bounds = array<i64: 1>, scalar_prefetch = 0 : i64, scratch_operands = 0 : i64, tpu.core_type = #tpu.core_type<tc>, window_params = [{pipeline_mode = #tpu.pipeline_mode<synchronous>, transform_indices = @transform_0, window_bounds = array<i64: 2, 256>}, {transform_indices = @transform_1, window_bounds = array<i64: 256, 512>}, {transform_indices = @transform_2, window_bounds = array<i64: 1, 512>}, {pipeline_mode = #tpu.pipeline_mode<synchronous>, transform_indices = @transform_3, window_bounds = array<i64: 1, 128>}, {pipeline_mode = #tpu.pipeline_mode<synchronous>, transform_indices = @transform_4, window_bounds = array<i64: 1, 128>}, {transform_indices = @transform_5, window_bounds = array<i64: 2, 512>}]} {
    %c0 = arith.constant 0 : index
    %c0_0 = arith.constant 0 : index
    %0 = vector.load %arg1[%c0, %c0_0] : memref<2x256xf32, #tpu.memory_space<vmem>>, vector<2x256xf32>
    %c0_1 = arith.constant 0 : index
    %c0_2 = arith.constant 0 : index
    %1 = vector.load %arg2[%c0_1, %c0_2] : memref<256x512xf32, #tpu.memory_space<vmem>>, vector<256x512xf32>
    %cst = arith.constant dense<0.000000e+00> : vector<2x512xf32>
    %2 = tpu.matmul %0, %1, %cst {dimension_numbers = #tpu.dot_dimension_numbers<[1], [0], [0], [1], [0, 0, 1, 1], [], []>} : vector<2x256xf32>, vector<256x512xf32>, vector<2x512xf32> -> vector<2x512xf32>
    %c0_3 = arith.constant 0 : index
    %c0_4 = arith.constant 0 : index
    %3 = vector.load %arg3[%c0_3, %c0_4] : memref<1x512xf32, #tpu.memory_space<vmem>>, vector<1x512xf32>
    %4 = vector.broadcast %3 : vector<1x512xf32> to vector<2x512xf32>
    %5 = arith.addf %2, %4 : vector<2x512xf32>
    %c0_5 = arith.constant 0 : index
    %c0_6 = arith.constant 0 : index
    %6 = vector.load %arg4[%c0_5, %c0_6] : memref<1x128xf32, #tpu.memory_space<vmem>>, vector<1x128xf32>
    %c0_7 = arith.constant 0 : index
    %c0_8 = arith.constant 0 : index
    %7 = vector.load %arg5[%c0_7, %c0_8] : memref<1x128xf32, #tpu.memory_space<vmem>>, vector<1x128xf32>
    %8 = vector.extract_strided_slice %5 {offsets = [0, 0], sizes = [2, 128], strides = [1, 1]} : vector<2x512xf32> to vector<2x128xf32>
    %cst_9 = arith.constant dense<0.000000e+00> : vector<2xf32>
    %9 = vector.multi_reduction <add>, %8, %cst_9 [1] : vector<2x128xf32> to vector<2xf32>
    %10 = vector.shape_cast %9 : vector<2xf32> to vector<2x1xf32>
    %cst_10 = arith.constant 1.280000e+02 : f32
    %11 = vector.broadcast %cst_10 : f32 to vector<2x1xf32>
    %12 = arith.divf %10, %11 : vector<2x1xf32>
    %13 = vector.broadcast %12 : vector<2x1xf32> to vector<2x128xf32>
    %14 = arith.subf %8, %13 : vector<2x128xf32>
    %15 = arith.mulf %14, %14 : vector<2x128xf32>
    %cst_11 = arith.constant dense<0.000000e+00> : vector<2xf32>
    %16 = vector.multi_reduction <add>, %15, %cst_11 [1] : vector<2x128xf32> to vector<2xf32>
    %17 = vector.shape_cast %16 : vector<2xf32> to vector<2x1xf32>
    %cst_12 = arith.constant 1.280000e+02 : f32
    %18 = vector.broadcast %cst_12 : f32 to vector<2x1xf32>
    %19 = arith.divf %17, %18 : vector<2x1xf32>
    %cst_13 = arith.constant 9.99999974E-6 : f32
    %20 = vector.broadcast %cst_13 : f32 to vector<2x1xf32>
    %21 = arith.addf %19, %20 : vector<2x1xf32>
    %22 = math.rsqrt %21 : vector<2x1xf32>
    %23 = vector.broadcast %22 : vector<2x1xf32> to vector<2x128xf32>
    %24 = arith.mulf %14, %23 : vector<2x128xf32>
    %25 = vector.broadcast %6 : vector<1x128xf32> to vector<2x128xf32>
    %26 = arith.mulf %24, %25 : vector<2x128xf32>
    %27 = vector.broadcast %7 : vector<1x128xf32> to vector<2x128xf32>
    %28 = arith.addf %26, %27 : vector<2x128xf32>
    %29 = vector.extract_strided_slice %5 {offsets = [0, 128], sizes = [2, 128], strides = [1, 1]} : vector<2x512xf32> to vector<2x128xf32>
    %cst_14 = arith.constant dense<0.000000e+00> : vector<2xf32>
    %30 = vector.multi_reduction <add>, %29, %cst_14 [1] : vector<2x128xf32> to vector<2xf32>
    %31 = vector.shape_cast %30 : vector<2xf32> to vector<2x1xf32>
    %cst_15 = arith.constant 1.280000e+02 : f32
    %32 = vector.broadcast %cst_15 : f32 to vector<2x1xf32>
    %33 = arith.divf %31, %32 : vector<2x1xf32>
    %34 = vector.broadcast %33 : vector<2x1xf32> to vector<2x128xf32>
    %35 = arith.subf %29, %34 : vector<2x128xf32>
    %36 = arith.mulf %35, %35 : vector<2x128xf32>
    %cst_16 = arith.constant dense<0.000000e+00> : vector<2xf32>
    %37 = vector.multi_reduction <add>, %36, %cst_16 [1] : vector<2x128xf32> to vector<2xf32>
    %38 = vector.shape_cast %37 : vector<2xf32> to vector<2x1xf32>
    %cst_17 = arith.constant 1.280000e+02 : f32
    %39 = vector.broadcast %cst_17 : f32 to vector<2x1xf32>
    %40 = arith.divf %38, %39 : vector<2x1xf32>
    %cst_18 = arith.constant 9.99999974E-6 : f32
    %41 = vector.broadcast %cst_18 : f32 to vector<2x1xf32>
    %42 = arith.addf %40, %41 : vector<2x1xf32>
    %43 = math.rsqrt %42 : vector<2x1xf32>
    %44 = vector.broadcast %43 : vector<2x1xf32> to vector<2x128xf32>
    %45 = arith.mulf %35, %44 : vector<2x128xf32>
    %46 = vector.broadcast %6 : vector<1x128xf32> to vector<2x128xf32>
    %47 = arith.mulf %45, %46 : vector<2x128xf32>
    %48 = vector.broadcast %7 : vector<1x128xf32> to vector<2x128xf32>
    %49 = arith.addf %47, %48 : vector<2x128xf32>
    %50 = vector.extract_strided_slice %5 {offsets = [0, 256], sizes = [2, 128], strides = [1, 1]} : vector<2x512xf32> to vector<2x128xf32>
    %cst_19 = arith.constant dense<0.000000e+00> : vector<2xf32>
    %51 = vector.multi_reduction <add>, %50, %cst_19 [1] : vector<2x128xf32> to vector<2xf32>
    %52 = vector.shape_cast %51 : vector<2xf32> to vector<2x1xf32>
    %cst_20 = arith.constant 1.280000e+02 : f32
    %53 = vector.broadcast %cst_20 : f32 to vector<2x1xf32>
    %54 = arith.divf %52, %53 : vector<2x1xf32>
    %55 = vector.broadcast %54 : vector<2x1xf32> to vector<2x128xf32>
    %56 = arith.subf %50, %55 : vector<2x128xf32>
    %57 = arith.mulf %56, %56 : vector<2x128xf32>
    %cst_21 = arith.constant dense<0.000000e+00> : vector<2xf32>
    %58 = vector.multi_reduction <add>, %57, %cst_21 [1] : vector<2x128xf32> to vector<2xf32>
    %59 = vector.shape_cast %58 : vector<2xf32> to vector<2x1xf32>
    %cst_22 = arith.constant 1.280000e+02 : f32
    %60 = vector.broadcast %cst_22 : f32 to vector<2x1xf32>
    %61 = arith.divf %59, %60 : vector<2x1xf32>
    %cst_23 = arith.constant 9.99999974E-6 : f32
    %62 = vector.broadcast %cst_23 : f32 to vector<2x1xf32>
    %63 = arith.addf %61, %62 : vector<2x1xf32>
    %64 = math.rsqrt %63 : vector<2x1xf32>
    %65 = vector.broadcast %64 : vector<2x1xf32> to vector<2x128xf32>
    %66 = arith.mulf %56, %65 : vector<2x128xf32>
    %67 = vector.broadcast %6 : vector<1x128xf32> to vector<2x128xf32>
    %68 = arith.mulf %66, %67 : vector<2x128xf32>
    %69 = vector.broadcast %7 : vector<1x128xf32> to vector<2x128xf32>
    %70 = arith.addf %68, %69 : vector<2x128xf32>
    %71 = vector.extract_strided_slice %5 {offsets = [0, 384], sizes = [2, 128], strides = [1, 1]} : vector<2x512xf32> to vector<2x128xf32>
    %cst_24 = arith.constant dense<0.000000e+00> : vector<2xf32>
    %72 = vector.multi_reduction <add>, %71, %cst_24 [1] : vector<2x128xf32> to vector<2xf32>
    %73 = vector.shape_cast %72 : vector<2xf32> to vector<2x1xf32>
    %cst_25 = arith.constant 1.280000e+02 : f32
    %74 = vector.broadcast %cst_25 : f32 to vector<2x1xf32>
    %75 = arith.divf %73, %74 : vector<2x1xf32>
    %76 = vector.broadcast %75 : vector<2x1xf32> to vector<2x128xf32>
    %77 = arith.subf %71, %76 : vector<2x128xf32>
    %78 = arith.mulf %77, %77 : vector<2x128xf32>
    %cst_26 = arith.constant dense<0.000000e+00> : vector<2xf32>
    %79 = vector.multi_reduction <add>, %78, %cst_26 [1] : vector<2x128xf32> to vector<2xf32>
    %80 = vector.shape_cast %79 : vector<2xf32> to vector<2x1xf32>
    %cst_27 = arith.constant 1.280000e+02 : f32
    %81 = vector.broadcast %cst_27 : f32 to vector<2x1xf32>
    %82 = arith.divf %80, %81 : vector<2x1xf32>
    %cst_28 = arith.constant 9.99999974E-6 : f32
    %83 = vector.broadcast %cst_28 : f32 to vector<2x1xf32>
    %84 = arith.addf %82, %83 : vector<2x1xf32>
    %85 = math.rsqrt %84 : vector<2x1xf32>
    %86 = vector.broadcast %85 : vector<2x1xf32> to vector<2x128xf32>
    %87 = arith.mulf %77, %86 : vector<2x128xf32>
    %88 = vector.broadcast %6 : vector<1x128xf32> to vector<2x128xf32>
    %89 = arith.mulf %87, %88 : vector<2x128xf32>
    %90 = vector.broadcast %7 : vector<1x128xf32> to vector<2x128xf32>
    %91 = arith.addf %89, %90 : vector<2x128xf32>
    %92 = tpu.concatenate %28, %49, %70, %91 in 1 : vector<2x128xf32>, vector<2x128xf32>, vector<2x128xf32>, vector<2x128xf32> -> vector<2x512xf32>
    %c0_29 = arith.constant 0 : index
    %c0_30 = arith.constant 0 : index
    %93 = vector.load %arg6[%c0_29, %c0_30] : memref<2x512xf32, #tpu.memory_space<vmem>>, vector<2x512xf32>
    tpu.vector_store %arg6[%c0_29, %c0_30], %92 {strides = array<i32>} : memref<2x512xf32, #tpu.memory_space<vmem>>, vector<2x512xf32>,
    return
  }
  func.func @transform_0(%arg0: i32) -> (i32, i32) {
    %c0_i32 = arith.constant 0 : i32
    %c0_i32_0 = arith.constant 0 : i32
    %c0_i32_1 = arith.constant 0 : i32
    return %c0_i32, %c0_i32_0 : i32, i32
  }
  func.func @transform_1(%arg0: i32) -> (i32, i32) {
    %c0_i32 = arith.constant 0 : i32
    %c0_i32_0 = arith.constant 0 : i32
    return %c0_i32, %arg0 : i32, i32
  }
  func.func @transform_2(%arg0: i32) -> (i32, i32) {
    %c0_i32 = arith.constant 0 : i32
    %c0_i32_0 = arith.constant 0 : i32
    return %c0_i32, %arg0 : i32, i32
  }
  func.func @transform_3(%arg0: i32) -> (i32, i32) {
    %c0_i32 = arith.constant 0 : i32
    %c0_i32_0 = arith.constant 0 : i32
    %c0_i32_1 = arith.constant 0 : i32
    return %c0_i32, %c0_i32_0 : i32, i32
  }
  func.func @transform_4(%arg0: i32) -> (i32, i32) {
    %c0_i32 = arith.constant 0 : i32
    %c0_i32_0 = arith.constant 0 : i32
    %c0_i32_1 = arith.constant 0 : i32
    return %c0_i32, %c0_i32_0 : i32, i32
  }
  func.func @transform_5(%arg0: i32) -> (i32, i32) {
    %c0_i32 = arith.constant 0 : i32
    %c0_i32_0 = arith.constant 0 : i32
    return %c0_i32, %arg0 : i32, i32
  }
}

</mosaic_0001>

<bundles_post_ra>
// kernel: tpu_custom_call.1
= control target key start
LH: loop header
LB: loop body
LE: loop exit
PB: predicated region body
PF: predicated region fallthrough
CT: control target
= control target key end

     0   :  { %10 = vsyncpa [#allocation3], 0  ;;  %s651_s0 = inlined_call_operand.hbm [shape: f32[2,256], index: 0, kind: input, shape index: {}]   ;;  %s652_s1 = inlined_call_operand.hbm [shape: f32[256,512], index: 1, kind: input, shape index: {}]   ;;  %s653_s2 = inlined_call_operand.hbm [shape: f32[1,512], index: 2, kind: input, shape index: {}]   ;;  %s654_s3 = inlined_call_operand.vmem [shape: f32[1,128], index: 3, kind: input, shape index: {}]   ;;  %s655_s4 = inlined_call_operand.vmem [shape: f32[1,128], index: 4, kind: input, shape index: {}]   ;;  %s656_s5 = inlined_call_operand.hbm [shape: f32[2,512], index: 5, kind: output, shape index: {}]  }
   0x1   :  { %11 = vsyncpa [#allocation6], 0 }
   0x2   :  { %12 = vsyncpa [#allocation4], 0  ;;  %s581_s18 = smov [#allocation5]  }
   0x3   :  { %s28_s19 = sshll.u32 %s581_s18, 4  ;;  %s29_s19 = int_to_ptr.vmem [resolvable:$true] %s28_s19 }
   0x4   :  { %s503_s20 = scalar_lea.vmem %s29_s19, 16384  ;;  %p508_p1 = scmp.lt.s32.totalorder %s29_s19, %s29_s19 }
   0x5   :  { %p504_p0 = scmp.ne.s32.totalorder %s29_s19, %s503_s20  ;;  %p509_p2 = scmp.lt.s32.totalorder %s503_s20, %s503_s20 }
   0x7   :  { %p510_p3 = por %p509_p2, %p508_p1 }
   0x9   :  { %p511_p4 = pnand %p510_p3, %p504_p0 }
   0xb   :  { %514 = shalt.err (!%p511_p4)
}
   0xc   :  { %s582_s21 = smov 512   ;;  %s583_s22 = smov 32  }
   0xd   :  { %34 = dma.hbm_to_vmem [thread:$0]  %s652_s1, 16384, %s29_s19, [#allocation6], %s582_s21, %s582_s21, %s583_s22  }
   0xe   :  { %s584_s25 = smov [#allocation2]   ;;  %s585_s27 = smov [#allocation7]  }
   0xf   :  { %s19_s26 = sshll.u32 %s584_s25, 4  ;;  %s41_s28 = sshll.u32 %s585_s27, 4  ;;  %s20_s26 = int_to_ptr.vmem [resolvable:$true] %s19_s26  ;;  %s42_s28 = int_to_ptr.vmem [resolvable:$true] %s41_s28 }
  0x10   :  { %s523_s29 = scalar_lea.vmem %s20_s26, 64  ;;  %p528_p6 = scmp.lt.s32.totalorder %s20_s26, %s20_s26 }
  0x11   :  { %p524_p5 = scmp.ne.s32.totalorder %s20_s26, %s523_s29  ;;  %p529_p7 = scmp.lt.s32.totalorder %s523_s29, %s523_s29 }
  0x13   :  { %p530_p8 = por %p529_p7, %p528_p6 }
  0x15   :  { %p531_p9 = pnand %p530_p8, %p524_p5 }
  0x17   :  { %534 = shalt.err (!%p531_p9)
}
  0x18   :  { %22 = dma.hbm_to_vmem [thread:$0]  %s651_s0, 64, %s20_s26, [#allocation3]  }
  0x19   :  { %s543_s7 = scalar_lea.vmem %s42_s28, 64  ;;  %p548_p11 = scmp.lt.s32.totalorder %s42_s28, %s42_s28 }
  0x1a   :  { %p544_p10 = scmp.ne.s32.totalorder %s42_s28, %s543_s7  ;;  %p549_p12 = scmp.lt.s32.totalorder %s543_s7, %s543_s7 }
  0x1c   :  { %p550_p13 = por %p549_p12, %p548_p11 }
  0x1e   :  { %p551_p0 = pnand %p550_p13, %p544_p10 }
  0x20   :  { %554 = shalt.err (!%p551_p0)
}
  0x21   :  { %44 = dma.hbm_to_vmem [thread:$0]  %s653_s2, 64, %s42_s28, [#allocation6]  }
  0x22   :  { %575 = dma.done.wait [#allocation3], 64  }
  0x23   :  { %576 = vsyncadd [#allocation3], 4294967232 }
  0x24   :  { %577 = dma.done.wait [#allocation6], 16448  }
  0x25   :  { %578 = vsyncadd [#allocation6], 4294950848  ;;  %v120_v0 = vld [vmem:[#allocation5 + $0x1e8] sm:$0xff]  ;;  %v122_v1 = vld [vmem:[#allocation5 + $0x1f8] sm:$0xff]  ;;  %vm364_vm0 = vcmask 1041408  }
  0x26   :  { %v119_v2 = vld [vmem:[#allocation5 + $0x1e0] sm:$0xff]  ;;  %220 = vmatprep.subr.mxu0 %v120_v0  ;;  %291 = vmatprep.subr.mxu1 %v122_v1  ;;  %v121_v3 = vld [vmem:[#allocation5 + $0x1f0] sm:$0xff]  ;;  %v116_v4 = vld [vmem:[#allocation5 + $0x1c8] sm:$0xff] }
  0x27   :  { %v118_v5 = vld [vmem:[#allocation5 + $0x1d8] sm:$0xff]  ;;  %221 = vmatpush1.msra.mxu0 %v119_v2  ;;  %292 = vmatpush1.msra.mxu1 %v121_v3  ;;  %v115_v6 = vld [vmem:[#allocation5 + $0x1c0] sm:$0xff]  ;;  %v117_v7 = vld [vmem:[#allocation5 + $0x1d0] sm:$0xff] }
  0x28   :  { %v112_v8 = vld [vmem:[#allocation5 + $0x1a8] sm:$0xff]  ;;  %222 = vmatprep.subr.mxu0 %v116_v4  ;;  %293 = vmatprep.subr.mxu1 %v118_v5  ;;  %v114_v9 = vld [vmem:[#allocation5 + $0x1b8] sm:$0xff]  ;;  %v111_v10 = vld [vmem:[#allocation5 + $0x1a0] sm:$0xff] }
  0x29   :  { %v113_v11 = vld [vmem:[#allocation5 + $0x1b0] sm:$0xff]  ;;  %223 = vmatpush1.msra.mxu0 %v115_v6  ;;  %294 = vmatpush1.msra.mxu1 %v117_v7  ;;  %v108_v12 = vld [vmem:[#allocation5 + $0x188] sm:$0xff]  ;;  %v110_v13 = vld [vmem:[#allocation5 + $0x198] sm:$0xff] }
  0x2a   :  { %224 = vmatprep.subr.mxu0 %v112_v8  ;;  %295 = vmatprep.subr.mxu1 %v114_v9  ;;  %v107_v14 = vld [vmem:[#allocation5 + $0x180] sm:$0xff]  ;;  %v109_v15 = vld [vmem:[#allocation5 + $0x190] sm:$0xff]  ;;  %v104_v16 = vld [vmem:[#allocation5 + $0x168] sm:$0xff] }
  0x2b   :  { %225 = vmatpush1.msra.mxu0 %v111_v10  ;;  %296 = vmatpush1.msra.mxu1 %v113_v11  ;;  %v106_v17 = vld [vmem:[#allocation5 + $0x178] sm:$0xff]  ;;  %v103_v18 = vld [vmem:[#allocation5 + $0x160] sm:$0xff]  ;;  %v105_v19 = vld [vmem:[#allocation5 + $0x170] sm:$0xff] }
  0x2c   :  { %226 = vmatprep.subr.mxu0 %v108_v12  ;;  %297 = vmatprep.subr.mxu1 %v110_v13  ;;  %v100_v20 = vld [vmem:[#allocation5 + $0x148] sm:$0xff]  ;;  %v102_v21 = vld [vmem:[#allocation5 + $0x158] sm:$0xff]  ;;  %v99_v22 = vld [vmem:[#allocation5 + $0x140] sm:$0xff] }
  0x2d   :  { %227 = vmatpush1.msra.mxu0 %v107_v14  ;;  %298 = vmatpush1.msra.mxu1 %v109_v15  ;;  %v101_v23 = vld [vmem:[#allocation5 + $0x150] sm:$0xff]  ;;  %v96_v24 = vld [vmem:[#allocation5 + $0x128] sm:$0xff]  ;;  %v98_v25 = vld [vmem:[#allocation5 + $0x138] sm:$0xff] }
  0x2e   :  { %228 = vmatprep.subr.mxu0 %v104_v16  ;;  %299 = vmatprep.subr.mxu1 %v106_v17  ;;  %v95_v26 = vld [vmem:[#allocation5 + $0x120] sm:$0xff]  ;;  %v97_v27 = vld [vmem:[#allocation5 + $0x130] sm:$0xff]  ;;  %v92_v28 = vld [vmem:[#allocation5 + $0x108] sm:$0xff] }
  0x2f   :  { %229 = vmatpush1.msra.mxu0 %v103_v18  ;;  %300 = vmatpush1.msra.mxu1 %v105_v19  ;;  %v94_v29 = vld [vmem:[#allocation5 + $0x118] sm:$0xff]  ;;  %v91_v30 = vld [vmem:[#allocation5 + $0x100] sm:$0xff]  ;;  %v93_v31 = vld [vmem:[#allocation5 + $0x110] sm:$0xff] }
  0x30   :  { %230 = vmatprep.subr.mxu0 %v100_v20  ;;  %301 = vmatprep.subr.mxu1 %v102_v21  ;;  %v88_v32 = vld [vmem:[#allocation5 + $0xe8] sm:$0xff]  ;;  %v90_v33 = vld [vmem:[#allocation5 + $0xf8] sm:$0xff]  ;;  %v87_v34 = vld [vmem:[#allocation5 + $0xe0] sm:$0xff] }
  0x31   :  { %231 = vmatpush1.msra.mxu0 %v99_v22  ;;  %302 = vmatpush1.msra.mxu1 %v101_v23  ;;  %v89_v35 = vld [vmem:[#allocation5 + $0xf0] sm:$0xff]  ;;  %v84_v36 = vld [vmem:[#allocation5 + $0xc8] sm:$0xff]  ;;  %v86_v37 = vld [vmem:[#allocation5 + $0xd8] sm:$0xff] }
  0x32   :  { %232 = vmatprep.subr.mxu0 %v96_v24  ;;  %303 = vmatprep.subr.mxu1 %v98_v25  ;;  %v83_v38 = vld [vmem:[#allocation5 + $0xc0] sm:$0xff]  ;;  %v85_v39 = vld [vmem:[#allocation5 + $0xd0] sm:$0xff]  ;;  %v80_v40 = vld [vmem:[#allocation5 + $0xa8] sm:$0xff] }
  0x33   :  { %233 = vmatpush1.msra.mxu0 %v95_v26  ;;  %304 = vmatpush1.msra.mxu1 %v97_v27  ;;  %v82_v41 = vld [vmem:[#allocation5 + $0xb8] sm:$0xff]  ;;  %v79_v42 = vld [vmem:[#allocation5 + $0xa0] sm:$0xff]  ;;  %v81_v43 = vld [vmem:[#allocation5 + $0xb0] sm:$0xff] }
  0x34   :  { %234 = vmatprep.subr.mxu0 %v92_v28  ;;  %305 = vmatprep.subr.mxu1 %v94_v29  ;;  %v76_v44 = vld [vmem:[#allocation5 + $0x88] sm:$0xff]  ;;  %v78_v45 = vld [vmem:[#allocation5 + $0x98] sm:$0xff]  ;;  %v75_v46 = vld [vmem:[#allocation5 + $0x80] sm:$0xff] }
  0x35   :  { %235 = vmatpush1.msra.mxu0 %v91_v30  ;;  %306 = vmatpush1.msra.mxu1 %v93_v31  ;;  %v77_v47 = vld [vmem:[#allocation5 + $0x90] sm:$0xff]  ;;  %v72_v48 = vld [vmem:[#allocation5 + $0x68] sm:$0xff]  ;;  %v74_v49 = vld [vmem:[#allocation5 + $0x78] sm:$0xff] }
  0x36   :  { %236 = vmatprep.subr.mxu0 %v88_v32  ;;  %307 = vmatprep.subr.mxu1 %v90_v33  ;;  %v71_v50 = vld [vmem:[#allocation5 + $0x60] sm:$0xff]  ;;  %v73_v51 = vld [vmem:[#allocation5 + $0x70] sm:$0xff]  ;;  %v68_v52 = vld [vmem:[#allocation5 + $0x48] sm:$0xff] }
  0x37   :  { %237 = vmatpush1.msra.mxu0 %v87_v34  ;;  %308 = vmatpush1.msra.mxu1 %v89_v35  ;;  %v70_v53 = vld [vmem:[#allocation5 + $0x58] sm:$0xff]  ;;  %v67_v54 = vld [vmem:[#allocation5 + $0x40] sm:$0xff]  ;;  %v69_v55 = vld [vmem:[#allocation5 + $0x50] sm:$0xff] }
  0x38   :  { %238 = vmatprep.subr.mxu0 %v84_v36  ;;  %309 = vmatprep.subr.mxu1 %v86_v37  ;;  %v64_v56 = vld [vmem:[#allocation5 + $0x28] sm:$0xff]  ;;  %v66_v57 = vld [vmem:[#allocation5 + $0x38] sm:$0xff]  ;;  %v63_v58 = vld [vmem:[#allocation5 + $0x20] sm:$0xff] }
  0x39   :  { %239 = vmatpush1.msra.mxu0 %v83_v38  ;;  %310 = vmatpush1.msra.mxu1 %v85_v39  ;;  %v65_v59 = vld [vmem:[#allocation5 + $0x30] sm:$0xff]  ;;  %v60_v60 = vld [vmem:[#allocation5 + $0x8] sm:$0xff]  ;;  %v62_v61 = vld [vmem:[#allocation5 + $0x18] sm:$0xff] }
  0x3a   :  { %240 = vmatprep.subr.mxu0 %v80_v40  ;;  %311 = vmatprep.subr.mxu1 %v82_v41  ;;  %v59_v62 = vld [vmem:[#allocation5] sm:$0xff]  ;;  %v61_v63 = vld [vmem:[#allocation5 + $0x10] sm:$0xff]  ;;  %v184_v0 = vld [vmem:[#allocation5 + $0x3e8] sm:$0xff] }
  0x3b   :  { %241 = vmatpush1.msra.mxu0 %v79_v42  ;;  %312 = vmatpush1.msra.mxu1 %v81_v43  ;;  %v186_v1 = vld [vmem:[#allocation5 + $0x3f8] sm:$0xff]  ;;  %v183_v2 = vld [vmem:[#allocation5 + $0x3e0] sm:$0xff]  ;;  %v185_v3 = vld [vmem:[#allocation5 + $0x3f0] sm:$0xff] }
  0x3c   :  { %242 = vmatprep.subr.mxu0 %v76_v44  ;;  %313 = vmatprep.subr.mxu1 %v78_v45  ;;  %v180_v4 = vld [vmem:[#allocation5 + $0x3c8] sm:$0xff]  ;;  %v182_v5 = vld [vmem:[#allocation5 + $0x3d8] sm:$0xff]  ;;  %v179_v6 = vld [vmem:[#allocation5 + $0x3c0] sm:$0xff] }
  0x3d   :  { %243 = vmatpush1.msra.mxu0 %v75_v46  ;;  %314 = vmatpush1.msra.mxu1 %v77_v47  ;;  %v181_v7 = vld [vmem:[#allocation5 + $0x3d0] sm:$0xff]  ;;  %v176_v8 = vld [vmem:[#allocation5 + $0x3a8] sm:$0xff]  ;;  %v178_v9 = vld [vmem:[#allocation5 + $0x3b8] sm:$0xff] }
  0x3e   :  { %244 = vmatprep.subr.mxu0 %v72_v48  ;;  %315 = vmatprep.subr.mxu1 %v74_v49  ;;  %v175_v10 = vld [vmem:[#allocation5 + $0x3a0] sm:$0xff]  ;;  %v177_v11 = vld [vmem:[#allocation5 + $0x3b0] sm:$0xff]  ;;  %v172_v12 = vld [vmem:[#allocation5 + $0x388] sm:$0xff] }
  0x3f   :  { %245 = vmatpush1.msra.mxu0 %v71_v50  ;;  %316 = vmatpush1.msra.mxu1 %v73_v51  ;;  %v174_v13 = vld [vmem:[#allocation5 + $0x398] sm:$0xff]  ;;  %v171_v14 = vld [vmem:[#allocation5 + $0x380] sm:$0xff]  ;;  %v173_v15 = vld [vmem:[#allocation5 + $0x390] sm:$0xff] }
  0x40   :  { %246 = vmatprep.subr.mxu0 %v68_v52  ;;  %317 = vmatprep.subr.mxu1 %v70_v53  ;;  %v168_v16 = vld [vmem:[#allocation5 + $0x368] sm:$0xff]  ;;  %v170_v17 = vld [vmem:[#allocation5 + $0x378] sm:$0xff]  ;;  %v167_v18 = vld [vmem:[#allocation5 + $0x360] sm:$0xff] }
  0x41   :  { %247 = vmatpush1.msra.mxu0 %v67_v54  ;;  %318 = vmatpush1.msra.mxu1 %v69_v55  ;;  %v169_v19 = vld [vmem:[#allocation5 + $0x370] sm:$0xff]  ;;  %v164_v20 = vld [vmem:[#allocation5 + $0x348] sm:$0xff]  ;;  %v166_v21 = vld [vmem:[#allocation5 + $0x358] sm:$0xff] }
  0x42   :  { %248 = vmatprep.subr.mxu0 %v64_v56  ;;  %319 = vmatprep.subr.mxu1 %v66_v57  ;;  %v163_v22 = vld [vmem:[#allocation5 + $0x340] sm:$0xff]  ;;  %v165_v23 = vld [vmem:[#allocation5 + $0x350] sm:$0xff]  ;;  %v160_v24 = vld [vmem:[#allocation5 + $0x328] sm:$0xff] }
  0x43   :  { %249 = vmatpush1.msra.mxu0 %v63_v58  ;;  %320 = vmatpush1.msra.mxu1 %v65_v59  ;;  %v162_v25 = vld [vmem:[#allocation5 + $0x338] sm:$0xff]  ;;  %v159_v26 = vld [vmem:[#allocation5 + $0x320] sm:$0xff]  ;;  %v161_v27 = vld [vmem:[#allocation5 + $0x330] sm:$0xff] }
  0x44   :  { %250 = vmatprep.subr.mxu0 %v60_v60  ;;  %321 = vmatprep.subr.mxu1 %v62_v61  ;;  %v156_v28 = vld [vmem:[#allocation5 + $0x308] sm:$0xff]  ;;  %v158_v29 = vld [vmem:[#allocation5 + $0x318] sm:$0xff]  ;;  %v155_v30 = vld [vmem:[#allocation5 + $0x300] sm:$0xff] }
  0x45   :  { %251 = vmatpush1.msra.mxu0 %v59_v62  ;;  %322 = vmatpush1.msra.mxu1 %v61_v63  ;;  %v157_v31 = vld [vmem:[#allocation5 + $0x310] sm:$0xff]  ;;  %v152_v32 = vld [vmem:[#allocation5 + $0x2e8] sm:$0xff]  ;;  %v154_v33 = vld [vmem:[#allocation5 + $0x2f8] sm:$0xff] }
  0x46   :  { %252 = vmatprep.subr.mxu0 %v184_v0  ;;  %323 = vmatprep.subr.mxu1 %v186_v1  ;;  %v151_v34 = vld [vmem:[#allocation5 + $0x2e0] sm:$0xff]  ;;  %v153_v35 = vld [vmem:[#allocation5 + $0x2f0] sm:$0xff]  ;;  %v148_v36 = vld [vmem:[#allocation5 + $0x2c8] sm:$0xff] }
  0x47   :  { %253 = vmatpush2.msra.mxu0 %v183_v2  ;;  %324 = vmatpush2.msra.mxu1 %v185_v3  ;;  %v150_v37 = vld [vmem:[#allocation5 + $0x2d8] sm:$0xff]  ;;  %v147_v38 = vld [vmem:[#allocation5 + $0x2c0] sm:$0xff]  ;;  %v149_v39 = vld [vmem:[#allocation5 + $0x2d0] sm:$0xff]  ;;  %v189_v2 = vlaneseq }
  0x48   :  { %254 = vmatprep.subr.mxu0 %v180_v4  ;;  %325 = vmatprep.subr.mxu1 %v182_v5  ;;  %v144_v40 = vld [vmem:[#allocation5 + $0x2a8] sm:$0xff]  ;;  %v146_v41 = vld [vmem:[#allocation5 + $0x2b8] sm:$0xff]  ;;  %v143_v42 = vld [vmem:[#allocation5 + $0x2a0] sm:$0xff] }
  0x49   :  { %255 = vmatpush2.msra.mxu0 %v179_v6  ;;  %326 = vmatpush2.msra.mxu1 %v181_v7  ;;  %v145_v43 = vld [vmem:[#allocation5 + $0x2b0] sm:$0xff]  ;;  %v140_v44 = vld [vmem:[#allocation5 + $0x288] sm:$0xff]  ;;  %v142_v45 = vld [vmem:[#allocation5 + $0x298] sm:$0xff]  ;;  %v627_v3 = vshrl.u32 %v189_v2, 7 }
  0x4a   :  { %256 = vmatprep.subr.mxu0 %v176_v8  ;;  %327 = vmatprep.subr.mxu1 %v178_v9  ;;  %v139_v46 = vld [vmem:[#allocation5 + $0x280] sm:$0xff]  ;;  %v141_v47 = vld [vmem:[#allocation5 + $0x290] sm:$0xff]  ;;  %v136_v48 = vld [vmem:[#allocation5 + $0x268] sm:$0xff] }
  0x4b   :  { %257 = vmatpush2.msra.mxu0 %v175_v10  ;;  %328 = vmatpush2.msra.mxu1 %v177_v11  ;;  %v138_v49 = vld [vmem:[#allocation5 + $0x278] sm:$0xff]  ;;  %v135_v50 = vld [vmem:[#allocation5 + $0x260] sm:$0xff]  ;;  %v137_v51 = vld [vmem:[#allocation5 + $0x270] sm:$0xff]  ;;  %v191_v4 = vsub.s32 0, %v627_v3  ;;  %v199_v5 = vsub.s32 2, %v627_v3  ;;  %v195_v7 = vsub.s32 1, %v627_v3 }
  0x4c   :  { %258 = vmatprep.subr.mxu0 %v172_v12  ;;  %329 = vmatprep.subr.mxu1 %v174_v13  ;;  %v132_v52 = vld [vmem:[#allocation5 + $0x248] sm:$0xff]  ;;  %v134_v53 = vld [vmem:[#allocation5 + $0x258] sm:$0xff]  ;;  %v131_v54 = vld [vmem:[#allocation5 + $0x240] sm:$0xff]  ;;  %v203_v8 = vsub.s32 3, %v627_v3 }
  0x4d   :  { %259 = vmatpush2.msra.mxu0 %v171_v14  ;;  %330 = vmatpush2.msra.mxu1 %v173_v15  ;;  %v133_v55 = vld [vmem:[#allocation5 + $0x250] sm:$0xff]  ;;  %v477_v56 = vld.sshfl [vmem:[#allocation2] sm:$0x33 pattern:$0x76325410]  ;;  %v128_v57 = vld [vmem:[#allocation5 + $0x228] sm:$0xff] }
  0x4e   :  { %260 = vmatprep.subr.mxu0 %v168_v16  ;;  %331 = vmatprep.subr.mxu1 %v170_v17  ;;  %v130_v58 = vld [vmem:[#allocation5 + $0x238] sm:$0xff]  ;;  %v127_v59 = vld [vmem:[#allocation5 + $0x220] sm:$0xff]  ;;  %v129_v60 = vld [vmem:[#allocation5 + $0x230] sm:$0xff]  ;;  %v217_v63 = vcombine.high %v477_v56, %v477_v56 }
  0x4f   :  { %261 = vmatpush2.msra.mxu0 %v167_v18  ;;  %332 = vmatpush2.msra.mxu1 %v169_v19  ;;  %v124_v61 = vld [vmem:[#allocation5 + $0x208] sm:$0xff]  ;;  %v126_v62 = vld [vmem:[#allocation5 + $0x218] sm:$0xff]  ;;  %v123_v0 = vld [vmem:[#allocation5 + $0x200] sm:$0xff] }
  0x50   :  { %262 = vmatprep.subr.mxu0 %v164_v20  ;;  %333 = vmatprep.subr.mxu1 %v166_v21  ;;  %v125_v1 = vld [vmem:[#allocation5 + $0x210] sm:$0xff]  ;;  %v187_v6 = vld [vmem:[#allocation7] sm:$0xf] }
  0x51   :  { %263 = vmatpush2.msra.mxu0 %v163_v22  ;;  %334 = vmatpush2.msra.mxu1 %v165_v23  ;;  %v192_v9 = vrot.slane %v187_v6, %v191_v4  ;;  %v200_v10 = vrot.slane %v187_v6, %v199_v5  ;;  %v196_v11 = vrot.slane %v187_v6, %v195_v7 }
  0x52   :  { %264 = vmatprep.subr.mxu0 %v160_v24  ;;  %335 = vmatprep.subr.mxu1 %v162_v25  ;;  %v204_v12 = vrot.slane %v187_v6, %v203_v8  ;;  %v479_v6 = vld [vmem:[%s655_s4] ss:$0 sm:$0xff] }
  0x53   :  { %265 = vmatpush2.msra.mxu0 %v159_v26  ;;  %336 = vmatpush2.msra.mxu1 %v161_v27 }
  0x54   :  { %266 = vmatprep.subr.mxu0 %v156_v28  ;;  %337 = vmatprep.subr.mxu1 %v158_v29 }
  0x55   :  { %267 = vmatpush2.msra.mxu0 %v155_v30  ;;  %338 = vmatpush2.msra.mxu1 %v157_v31 }
  0x56   :  { %268 = vmatprep.subr.mxu0 %v152_v32  ;;  %339 = vmatprep.subr.mxu1 %v154_v33 }
  0x57   :  { %269 = vmatpush2.msra.mxu0 %v151_v34  ;;  %340 = vmatpush2.msra.mxu1 %v153_v35 }
  0x58   :  { %270 = vmatprep.subr.mxu0 %v148_v36  ;;  %341 = vmatprep.subr.mxu1 %v150_v37 }
  0x59   :  { %271 = vmatpush2.msra.mxu0 %v147_v38  ;;  %342 = vmatpush2.msra.mxu1 %v149_v39 }
  0x5a   :  { %272 = vmatprep.subr.mxu0 %v144_v40  ;;  %343 = vmatprep.subr.mxu1 %v146_v41 }
  0x5b   :  { %273 = vmatpush2.msra.mxu0 %v143_v42  ;;  %344 = vmatpush2.msra.mxu1 %v145_v43 }
  0x5c   :  { %274 = vmatprep.subr.mxu0 %v140_v44  ;;  %345 = vmatprep.subr.mxu1 %v142_v45 }
  0x5d   :  { %275 = vmatpush2.msra.mxu0 %v139_v46  ;;  %346 = vmatpush2.msra.mxu1 %v141_v47 }
  0x5e   :  { %276 = vmatprep.subr.mxu0 %v136_v48  ;;  %347 = vmatprep.subr.mxu1 %v138_v49 }
  0x5f   :  { %277 = vmatpush2.msra.mxu0 %v135_v50  ;;  %348 = vmatpush2.msra.mxu1 %v137_v51 }
  0x60   :  { %278 = vmatprep.subr.mxu0 %v132_v52  ;;  %349 = vmatprep.subr.mxu1 %v134_v53 }
  0x61   :  { %279 = vmatpush2.msra.mxu0 %v131_v54  ;;  %350 = vmatpush2.msra.mxu1 %v133_v55 }
  0x62   :  { %280 = vmatprep.subr.mxu0 %v128_v57  ;;  %351 = vmatprep.subr.mxu1 %v130_v58 }
  0x63   :  { %281 = vmatpush2.msra.mxu0 %v127_v59  ;;  %352 = vmatpush2.msra.mxu1 %v129_v60  ;;  %v478_v60 = vld [vmem:[%s654_s3] ss:$0 sm:$0xff]  ;;  %s587_s3 = smov [#allocation8]  }
  0x64   :  { %282 = vmatprep.subr.mxu0 %v124_v61  ;;  %353 = vmatprep.subr.mxu1 %v126_v62  ;;  %s467_s11 = sshll.u32 %s587_s3, 4  ;;  %s468_s11 = int_to_ptr.vmem [resolvable:$true] %s467_s11 }
  0x65   :  { %283 = vmatpush2.msra.mxu0 %v123_v0  ;;  %284 = vmatprep.mubr.f32.mxu0 %v217_v63  ;;  %s555_s4 = scalar_lea.vmem %s468_s11, 128  ;;  %p560_p2 = scmp.lt.s32.totalorder %s468_s11, %s468_s11 }
  0x66   :  { %354 = vmatpush2.msra.mxu1 %v125_v1  ;;  %355 = vmatprep.mubr.f32.mxu1 %v217_v63  ;;  %v586_v63 = vmov 1983009808   ;;  %p556_p1 = scmp.ne.s32.totalorder %s468_s11, %s555_s4  ;;  %p561_p3 = scmp.lt.s32.totalorder %s555_s4, %s555_s4 }
  0x67   :  { %285 = vmatmul.mubr.f32.vlgmr.msra.gmra.mxu0 %v477_v56  ;;  %356 = vmatmul.mubr.f32.vlgmr.msra.gmra.mxu1 %v477_v56  ;;  %v445_v0 = vunpack.c.l.s4 %v586_v63 }
  0x68   :  { %p562_p4 = por %p561_p3, %p560_p2 }
  0x6a   :  { %p563_p5 = pnand %p562_p4, %p556_p1 }
 0x127   :  { %v286_v13 = vpop.f32.mrf.mxu0  ;;  %v357_v14 = vpop.f32.mrf.mxu1 }
 0x128   :  { %v287_v15 = vadd.f32 %v286_v13, %v192_v9  ;;  %v358_v16 = vadd.f32 %v357_v14, %v200_v10  ;;  %v446_v10 = vunpack.c.0.s8 %v445_v0 }
 0x129   :  { %v288_v17 = vpop.f32.mrf.mxu0  ;;  %v359_v18 = vpop.f32.mrf.mxu1 }
 0x12a   :  { %v289_v19 = vadd.f32 %v288_v17, %v196_v11  ;;  %v360_v20 = vadd.f32 %v359_v18, %v204_v12  ;;  %v408_v21 = vsel %vm364_vm0, %v358_v16, 0.0  ;;  %v365_v22 = vsel %vm364_vm0, %v287_v15, 0.0 }
 0x12b   :  { %409 = vadd.xlane.f32.xlu1 %v408_v21  ;;  %366 = vadd.xlane.f32.xlu0 %v365_v22 }
 0x12c   :  { %v423_v23 = vsel %vm364_vm0, %v360_v20, 0.0  ;;  %v393_v24 = vsel %vm364_vm0, %v289_v19, 0.0 }
 0x12f   :  { %424 = vadd.xlane.f32.xlu1 %v423_v23  ;;  %394 = vadd.xlane.f32.xlu0 %v393_v24 }
 0x1b4   :  { %v410_v25 = vpop.xlane.xlu1 %409  ;;  %v367_v26 = vpop.xlane.xlu0 %366 }
 0x1b5   :  { %v411_v27 = vmul.f32 0.0078125, %v410_v25  ;;  %v369_v28 = vmul.f32 0.0078125, %v367_v26 }
 0x1b7   :  { %v412_v29 = vsub.f32 %v358_v16, %v411_v27  ;;  %v370_v30 = vsub.f32 %v287_v15, %v369_v28  ;;  %v449_v16 = vsub.s32 %v446_v10, %v627_v3 }
 0x1b8   :  { %v425_v31 = vpop.xlane.xlu1 %424  ;;  %v395_v32 = vpop.xlane.xlu0 %394 }
 0x1b9   :  { %v426_v33 = vmul.f32 0.0078125, %v425_v31  ;;  %v396_v34 = vmul.f32 0.0078125, %v395_v32  ;;  %v371_v35 = vmul.f32 %v370_v30, %v370_v30  ;;  %v413_v39 = vmul.f32 %v412_v29, %v412_v29 }
 0x1bb   :  { %v427_v36 = vsub.f32 %v360_v20, %v426_v33  ;;  %v397_v37 = vsub.f32 %v289_v19, %v396_v34  ;;  %v372_v38 = vsel %vm364_vm0, %v371_v35, 0.0  ;;  %v414_v41 = vsel %vm364_vm0, %v413_v39, 0.0 }
 0x1bc   :  { %373 = vadd.xlane.f32.xlu0 %v372_v38 }
 0x1bd   :  { %v398_v40 = vmul.f32 %v397_v37, %v397_v37  ;;  %v428_v43 = vmul.f32 %v427_v36, %v427_v36 }
 0x1bf   :  { %v399_v42 = vsel %vm364_vm0, %v398_v40, 0.0  ;;  %v429_v44 = vsel %vm364_vm0, %v428_v43, 0.0 }
 0x1c0   :  { %415 = vadd.xlane.f32.xlu0 %v414_v41  ;;  %400 = vadd.xlane.f32.xlu1 %v399_v42 }
 0x1c4   :  { %430 = vadd.xlane.f32.xlu1 %v429_v44 }
 0x245   :  { %v374_v45 = vpop.xlane.xlu0 %373 }
 0x246   :  { %v375_v46 = vmul.f32 0.0078125, %v374_v45 }
 0x248   :  { %v376_v47 = vadd.f32 1e-05, %v375_v46 }
 0x249   :  { %v401_v48 = vpop.xlane.xlu1 %400  ;;  %v416_v49 = vpop.xlane.xlu0 %415 }
 0x24a   :  { %487 = vrsqrt.f32 %v376_v47  ;;  %v402_v50 = vmul.f32 0.0078125, %v401_v48  ;;  %v417_v51 = vmul.f32 0.0078125, %v416_v49 }
 0x24c   :  { %v403_v52 = vadd.f32 1e-05, %v402_v50  ;;  %v418_v53 = vadd.f32 1e-05, %v417_v51 }
 0x24d   :  { %v431_v54 = vpop.xlane.xlu1 %430 }
 0x24e   :  { %489 = vrsqrt.f32 %v403_v52  ;;  %v432_v55 = vmul.f32 0.0078125, %v431_v54 }
 0x24f   :  { %491 = vrsqrt.f32 %v418_v53 }
 0x250   :  { %v433_v56 = vadd.f32 1e-05, %v432_v55 }
 0x252   :  { %493 = vrsqrt.f32 %v433_v56 }
 0x257   :  { %v488_v57 = vpop.eup %487 }
 0x258   :  { %v378_v58 = vmul.f32 %v488_v57, %v370_v30 }
 0x25a   :  { %v385_v2 = vmul.f32 %v478_v60, %v378_v58 }
 0x25b   :  { %v490_v59 = vpop.eup %489 }
 0x25c   :  { %v492_v61 = vpop.eup %491  ;;  %v405_v62 = vmul.f32 %v490_v59, %v397_v37  ;;  %v392_v11 = vadd.f32 %v479_v6, %v385_v2 }
 0x25d   :  { %v420_v1 = vmul.f32 %v492_v61, %v412_v29 }
 0x25e   :  { %v406_v4 = vmul.f32 %v478_v60, %v405_v62 }
 0x25f   :  { %v494_v5 = vpop.eup %493  ;;  %v421_v8 = vmul.f32 %v478_v60, %v420_v1 }
 0x260   :  { %v407_v7 = vadd.f32 %v479_v6, %v406_v4  ;;  %v435_v9 = vmul.f32 %v494_v5, %v427_v36 }
 0x261   :  { %v422_v13 = vadd.f32 %v479_v6, %v421_v8 }
 0x262   :  { %v436_v12 = vmul.f32 %v478_v60, %v435_v9  ;;  %v442_v15 = vcombine.low %v392_v11, %v407_v7 }
 0x264   :  { %v437_v14 = vadd.f32 %v479_v6, %v436_v12  ;;  %v450_v18 = vrot.slane %v442_v15, %v449_v16 }
 0x266   :  { %v443_v17 = vcombine.low %v422_v13, %v437_v14 }
 0x268   :  { %v457_v19 = vrot.slane %v443_v17, %v449_v16 }
 0x26a   :  { %v458_v20 = vcombine.low %v450_v18, %v457_v19 }
 0x26c   :  { %460 = vst [vmem:[#allocation8] sm:$0xff] %v458_v20 }
 0x26d   :  { %566 = shalt.err (!%p563_p5)
}
 0x26e   :  { %470 = dma.vmem_to_hbm [thread:$0]  %s468_s11, 128, %s656_s5, [#allocation4]  }
 0x26f   :  { %579 = dma.done.wait [#allocation4], 128  }
 0x270   :  { %580 = vsyncadd [#allocation4], 4294967168 }
 0x271   :  { %474 = vsyncpa [#allocation3], 1 }
 0x272   :  { %475 = vsyncpa [#allocation6], 1 }
 0x273   :  { %476 = vsyncpa [#allocation4], 1 }

</bundles_post_ra>
